<compile_context>
chip_gen: v7x
topology: tpu7x:2x2x1
jax: 0.10.0
libtpu: 0.0.40
codegen_flags: <defaults>
</compile_context>

<pallas_src>
import jax
import jax.numpy as jnp
from jax import lax
from jax.experimental import pallas as pl
from jax.experimental.pallas import tpu as pltpu

_EPS = 1e-5  # nn.LayerNorm default


def _addnorm_kernel(prev_ref, new_ref, gamma_ref, beta_ref, out_ref):
    # Residual add, then LayerNorm over the last dim.  f32 math throughout
    # (required on v5e: VPU has no bf16; also matches PyTorch accumulation).
    x = prev_ref[...].astype(jnp.float32) + new_ref[...].astype(jnp.float32)

    # Single pass: row mean and mean of squares -> biased variance.
    # (E[x^2] - mean^2 is fine in f32 for typical activation magnitudes; if
    # inputs can carry very large offsets, switch back to the two-pass
    # mean((x - mean)^2) form.)
    mean = jnp.mean(x, axis=-1, keepdims=True)
    mean_sq = jnp.mean(x * x, axis=-1, keepdims=True)
    var = jnp.maximum(mean_sq - mean * mean, 0.0)
    inv = lax.rsqrt(var + _EPS)

    g = gamma_ref[...]  # already f32 (precast in wrapper), shape (1, D)
    b = beta_ref[...]

    # Fold the mean subtraction into the affine: y = x*scale + shift.
    scale = inv * g                      # (tile, D)
    shift = b - mean * scale             # (tile, D)
    out_ref[...] = (x * scale + shift).astype(out_ref.dtype)


def _sublane_base(itemsize: int) -> int:
    # Native packed sublane tile: 8 rows for 4-byte, 16 for 2-byte, 32 for 1B.
    return {4: 8, 2: 16, 1: 32}.get(itemsize, 8)


def _round_up(x: int, m: int) -> int:
    return ((x + m - 1) // m) * m


def _tpu_vmem_capacity_bytes() -> int:
    try:
        info = pltpu.get_tpu_info()
        cap = getattr(info, "vmem_capacity_bytes", None)
        if cap:
            return int(cap)
    except Exception:
        pass
    # Conservative fallback: assume the smallest (v7x per-core) VMEM.
    return 64 * 1024 * 1024


def _generation_params():
    """Returns (tile_budget_bytes, vmem_limit_bytes, max_row_tile,
    min_grid_steps, two_core)."""
    cap = _tpu_vmem_capacity_bytes()
    small_vmem = cap <= 64 * 1024 * 1024  # v7x-class (also 2 TCs/chip)
    if small_vmem:
        return (24 * 1024 * 1024, 40 * 1024 * 1024, 512, 8, True)
    # v5e / v6e: 128 MiB VMEM, single TensorCore.
    return (80 * 1024 * 1024, 96 * 1024 * 1024, 1024, 4, False)


def _pick_row_tile(rows: int, D: int, itemsize: int,
                   tile_budget: int, max_row_tile: int,
                   min_grid_steps: int, two_core: bool) -> int:
    base = _sublane_base(itemsize)
    # Per-row VMEM cost estimate:
    #   3 pipelined operands (prev, new, out) x 2 buffers in the I/O dtype
    #   + ~4 f32 full-tile intermediates (x, scale, shift, y / slack).
    per_row_bytes = 6 * D * itemsize + 4 * D * 4
    cap = max(base, (tile_budget // per_row_bytes) // base * base)
    cap = min(cap, max_row_tile)
    # Keep enough grid steps for pipeline amortization / both v7x cores.
    target = _round_up(max(1, pl.cdiv(rows, min_grid_steps)), base)
    row_tile = min(cap, target, _round_up(rows, base))
    row_tile = max(base, row_tile)

    if two_core:
        # Prefer an even number of grid steps so the parallel axis splits
        # evenly across the 2 TensorCores.
        steps = pl.cdiv(rows, row_tile)
        if steps > 1 and steps % 2 == 1:
            alt = max(base, _round_up(pl.cdiv(rows, steps + 1), base))
            if pl.cdiv(rows, alt) % 2 == 0:
                row_tile = alt
    return row_tile


def add_and_norm(previous_x, new_x, gamma, beta, *, row_tile=None):
    assert previous_x.shape == new_x.shape
    orig_shape = previous_x.shape
    D = orig_shape[-1]
    rows = 1
    for s in orig_shape[:-1]:
        rows *= s

    io_dtype = previous_x.dtype
    itemsize = jnp.dtype(io_dtype).itemsize
    tile_budget, vmem_limit, max_row_tile, min_steps, two_core = (
        _generation_params())

    if row_tile is None:
        row_tile = _pick_row_tile(rows, D, itemsize, tile_budget,
                                  max_row_tile, min_steps, two_core)
    else:
        base = _sublane_base(itemsize)
        row_tile = max(base, _round_up(row_tile, base))

    prev2d = previous_x.reshape(rows, D)
    new2d = new_x.reshape(rows, D)
    # Precast LayerNorm params to the compute dtype once, outside the kernel.
    gamma2d = gamma.astype(jnp.float32).reshape(1, D)
    beta2d = beta.astype(jnp.float32).reshape(1, D)

    # Ragged final block handled by Pallas (no pad / slice HBM round-trips).
    grid = (pl.cdiv(rows, row_tile),)

    cost = pl.CostEstimate(
        flops=int(7 * rows * D),
        bytes_accessed=int(3 * rows * D * itemsize + 2 * D * 4),
        transcendentals=int(rows),
    )

    out2d = pl.pallas_call(
        _addnorm_kernel,
        out_shape=jax.ShapeDtypeStruct((rows, D), io_dtype),
        grid_spec=pltpu.PrefetchScalarGridSpec(
            num_scalar_prefetch=0,
            grid=grid,
            in_specs=[
                pl.BlockSpec((row_tile, D), lambda i: (i, 0)),
                pl.BlockSpec((row_tile, D), lambda i: (i, 0)),
                pl.BlockSpec((1, D), lambda i: (0, 0)),
                pl.BlockSpec((1, D), lambda i: (0, 0)),
            ],
            out_specs=pl.BlockSpec((row_tile, D), lambda i: (i, 0)),
        ),
        compiler_params=pltpu.CompilerParams(
            dimension_semantics=("parallel",),
            vmem_limit_bytes=vmem_limit,
        ),
        cost_estimate=cost,
    )(prev2d, new2d, gamma2d, beta2d)

    return out2d.reshape(orig_shape)


if __name__ == "__main__":
    B, S, D = 2, 8, 32

    key = jax.random.PRNGKey(0)
    k1, k2 = jax.random.split(key)
    previous_x = jax.random.normal(k1, (B, S, D), dtype=jnp.float32)
    new_x = jax.random.normal(k2, (B, S, D), dtype=jnp.float32)

    # Deterministic LayerNorm parameters (non-trivial so scale/shift is
    # exercised; PyTorch default init would be gamma=1, beta=0).
    gamma = jnp.linspace(0.5, 1.5, D, dtype=jnp.float32)
    beta = jnp.linspace(-0.1, 0.1, D, dtype=jnp.float32)

    out = add_and_norm(previous_x, new_x, gamma, beta)
    out = jax.block_until_ready(out)

    # Pure-JAX reference check.
    x = previous_x + new_x
    mean = jnp.mean(x, axis=-1, keepdims=True)
    var = jnp.mean((x - mean) ** 2, axis=-1, keepdims=True)
    ref = (x - mean) * lax.rsqrt(var + _EPS) * gamma + beta
    assert out.shape == previous_x.shape
    assert jnp.allclose(out, ref, atol=1e-5, rtol=1e-5)

    print("KERNEL_OK")
</pallas_src>

<mosaic_0001>
module attributes {stable_mosaic.version = 11 : i64} {
  func.func @_addnorm_kernel(%arg0: i32, %arg1: memref<8x32xf32, #tpu.memory_space<vmem>>, %arg2: memref<8x32xf32, #tpu.memory_space<vmem>>, %arg3: memref<1x32xf32, #tpu.memory_space<vmem>>, %arg4: memref<1x32xf32, #tpu.memory_space<vmem>>, %arg5: memref<8x32xf32, #tpu.memory_space<vmem>>) attributes {dimension_semantics = [#tpu.dimension_semantics<parallel>], iteration_bounds = array<i64: 2>, scalar_prefetch = 0 : i64, scratch_operands = 0 : i64, tpu.core_type = #tpu.core_type<tc>, window_params = [{transform_indices = @transform_0, window_bounds = array<i64: 8, 32>}, {transform_indices = @transform_1, window_bounds = array<i64: 8, 32>}, {pipeline_mode = #tpu.pipeline_mode<synchronous>, transform_indices = @transform_2, window_bounds = array<i64: 1, 32>}, {pipeline_mode = #tpu.pipeline_mode<synchronous>, transform_indices = @transform_3, window_bounds = array<i64: 1, 32>}, {transform_indices = @transform_4, window_bounds = array<i64: 8, 32>}]} {
    %c0 = arith.constant 0 : index
    %c0_0 = arith.constant 0 : index
    %0 = vector.load %arg1[%c0, %c0_0] : memref<8x32xf32, #tpu.memory_space<vmem>>, vector<8x32xf32>
    %c0_1 = arith.constant 0 : index
    %c0_2 = arith.constant 0 : index
    %1 = vector.load %arg2[%c0_1, %c0_2] : memref<8x32xf32, #tpu.memory_space<vmem>>, vector<8x32xf32>
    %2 = arith.addf %0, %1 : vector<8x32xf32>
    %cst = arith.constant dense<0.000000e+00> : vector<8xf32>
    %3 = vector.multi_reduction <add>, %2, %cst [1] : vector<8x32xf32> to vector<8xf32>
    %4 = vector.shape_cast %3 : vector<8xf32> to vector<8x1xf32>
    %cst_3 = arith.constant 3.200000e+01 : f32
    %5 = vector.broadcast %cst_3 : f32 to vector<8x1xf32>
    %6 = arith.divf %4, %5 : vector<8x1xf32>
    %7 = arith.mulf %2, %2 : vector<8x32xf32>
    %cst_4 = arith.constant dense<0.000000e+00> : vector<8xf32>
    %8 = vector.multi_reduction <add>, %7, %cst_4 [1] : vector<8x32xf32> to vector<8xf32>
    %9 = vector.shape_cast %8 : vector<8xf32> to vector<8x1xf32>
    %cst_5 = arith.constant 3.200000e+01 : f32
    %10 = vector.broadcast %cst_5 : f32 to vector<8x1xf32>
    %11 = arith.divf %9, %10 : vector<8x1xf32>
    %12 = arith.mulf %6, %6 : vector<8x1xf32>
    %13 = arith.subf %11, %12 : vector<8x1xf32>
    %cst_6 = arith.constant 0.000000e+00 : f32
    %14 = vector.broadcast %cst_6 : f32 to vector<8x1xf32>
    %15 = arith.maximumf %13, %14 : vector<8x1xf32>
    %cst_7 = arith.constant 9.99999974E-6 : f32
    %16 = vector.broadcast %cst_7 : f32 to vector<8x1xf32>
    %17 = arith.addf %15, %16 : vector<8x1xf32>
    %18 = math.rsqrt %17 : vector<8x1xf32>
    %c0_8 = arith.constant 0 : index
    %c0_9 = arith.constant 0 : index
    %19 = vector.load %arg3[%c0_8, %c0_9] : memref<1x32xf32, #tpu.memory_space<vmem>>, vector<1x32xf32>
    %c0_10 = arith.constant 0 : index
    %c0_11 = arith.constant 0 : index
    %20 = vector.load %arg4[%c0_10, %c0_11] : memref<1x32xf32, #tpu.memory_space<vmem>>, vector<1x32xf32>
    %21 = vector.broadcast %18 : vector<8x1xf32> to vector<8x32xf32>
    %22 = vector.broadcast %19 : vector<1x32xf32> to vector<8x32xf32>
    %23 = arith.mulf %21, %22 : vector<8x32xf32>
    %24 = vector.broadcast %6 : vector<8x1xf32> to vector<8x32xf32>
    %25 = arith.mulf %24, %23 : vector<8x32xf32>
    %26 = vector.broadcast %20 : vector<1x32xf32> to vector<8x32xf32>
    %27 = arith.subf %26, %25 : vector<8x32xf32>
    %28 = arith.mulf %2, %23 : vector<8x32xf32>
    %29 = arith.addf %28, %27 : vector<8x32xf32>
    %c0_12 = arith.constant 0 : index
    %c0_13 = arith.constant 0 : index
    %30 = vector.load %arg5[%c0_12, %c0_13] : memref<8x32xf32, #tpu.memory_space<vmem>>, vector<8x32xf32>
    tpu.vector_store %arg5[%c0_12, %c0_13], %29 {strides = array<i32>} : memref<8x32xf32, #tpu.memory_space<vmem>>, vector<8x32xf32>,
    return
  }
  func.func @transform_0(%arg0: i32) -> (i32, i32) {
    %c0_i32 = arith.constant 0 : i32
    %c0_i32_0 = arith.constant 0 : i32
    return %arg0, %c0_i32 : i32, i32
  }
  func.func @transform_1(%arg0: i32) -> (i32, i32) {
    %c0_i32 = arith.constant 0 : i32
    %c0_i32_0 = arith.constant 0 : i32
    return %arg0, %c0_i32 : i32, i32
  }
  func.func @transform_2(%arg0: i32) -> (i32, i32) {
    %c0_i32 = arith.constant 0 : i32
    %c0_i32_0 = arith.constant 0 : i32
    %c0_i32_1 = arith.constant 0 : i32
    return %c0_i32, %c0_i32_0 : i32, i32
  }
  func.func @transform_3(%arg0: i32) -> (i32, i32) {
    %c0_i32 = arith.constant 0 : i32
    %c0_i32_0 = arith.constant 0 : i32
    %c0_i32_1 = arith.constant 0 : i32
    return %c0_i32, %c0_i32_0 : i32, i32
  }
  func.func @transform_4(%arg0: i32) -> (i32, i32) {
    %c0_i32 = arith.constant 0 : i32
    %c0_i32_0 = arith.constant 0 : i32
    return %arg0, %c0_i32 : i32, i32
  }
}

</mosaic_0001>

<bundles_post_ra>
// kernel: tpu_custom_call.1
= control target key start
LH: loop header
LB: loop body
LE: loop exit
PB: predicated region body
PF: predicated region fallthrough
CT: control target
= control target key end

     0   :  { %9 = vsyncpa [#allocation3], 0  ;;  %s849_s0 = inlined_call_operand.hbm [shape: f32[16,32], index: 0, kind: input, shape index: {}]   ;;  %s850_s1 = inlined_call_operand.hbm [shape: f32[16,32], index: 1, kind: input, shape index: {}]   ;;  %s851_s2 = inlined_call_operand.vmem [shape: f32[1,32], index: 2, kind: input, shape index: {}]   ;;  %s852_s3 = inlined_call_operand.vmem [shape: f32[1,32], index: 3, kind: input, shape index: {}]   ;;  %s853_s4 = inlined_call_operand.hbm [shape: f32[16,32], index: 4, kind: output, shape index: {}]  }
   0x1   :  { %11 = vsyncpa [#allocation3 + $0x1], 0 }
   0x2   :  { %12 = vsyncpa [#allocation6], 0 }
   0x3   :  { %14 = vsyncpa [#allocation6 + $0x1], 0 }
   0x4   :  { %15 = vsyncpa [#allocation4], 0 }
   0x5   :  { %17 = vsyncpa [#allocation4 + $0x1], 0  ;;  %s626_s15 = smov 0   ;;  %s628_s16 = smov 0  }
   0x6   :  { %s630_s17 = smov 0   ;;  %s632_s18 = smov 0  }
   0x7 LB: > { %s647_s19 = sadd.s32 4294967295, %s596_s18   ;;  %s396_s20 = sadd.s32 4294967294, %s596_s18   ;;  %s596_s18 = sphi %s632_s18, %s872_s18   ;;  %s592_s17 = sphi %s630_s17, %s871_s17   ;;  %s588_s16 = sphi %s628_s16, %s870_s16   ;;  %s584_s15 = sphi %s626_s15, %s869_s15  }
   0x8   : > { %s651_s21 = sadd.s32 1, %s596_s18   ;;  %s30_s22 = sadd.s32 1, %s592_s17 }
   0x9   : > { %s27_s23 = ssub.s32 %s596_s18, %s651_s21  ;;  %p37_p0 = scmp.ne.s32.totalorder %s592_s17, %s588_s16 }
   0xa   : > { %p28_p1 = scmp.eq.s32.totalorder %s27_s23, 0  ;;  %p38_p2 = scmp.eq.s32.totalorder %s596_s18, 0 }
   0xb   : > { %p43_p3 = scmp.ne.s32.totalorder %s588_s16, %s584_s15  ;;  %p44_p4 = scmp.eq.s32.totalorder %s647_s19, 0 }
   0xc   : > { %s663_s24 = scalar_select %p28_p1, %s592_s17, %s30_s22  }
   0xd   : > { %p665_p5 = por %p38_p2, %p37_p0  ;;  %p669_p6 = por %p44_p4, %p43_p3 }
   0xe   : > { %p135_p7 = scmp.eq.s32.totalorder %s647_s19, 1  ;;  %p141_p8 = scmp.eq.s32.totalorder %s396_s20, 1 }
   0xf   : > { %s857_s26 = scalar_select %p669_p6, 1, 0 }
  0x10   : > { %p430_p10 = scmp.lt.s32.totalorder %s596_s18, 2  ;;  %p676_p11 = por %p135_p7, %p37_p0 }
  0x11   : > { %p680_p12 = por %p141_p8, %p43_p3  ;;  %s685_s29 = sand.u32 1, %s592_s17  }
  0x12   : > { %s858_s27 = scalar_select %p676_p11, 1, 0 }
  0x13   : > { %s859_s28 = scalar_select %p680_p12, 1, 0 }
  0x14   : > { %s400_s30 = sshll.u32 %s596_s18, 7  ;;  %s399_s5 = sshll.u32 %s685_s29, 3 }
  0x15   : > { %s694_s8 = scalar_lea.hbm %s849_s0, %s400_s30  ;;  %s171_s9 = scalar_lea.vmem [#allocation2], %s399_s5 }
  0x16   : > { %s178_s10 = sshll.u32 %s171_s9, 4  ;;  %p700_p13 = pnand %p430_p10, %p665_p5  ;;  %s704_s10 = int_to_ptr.vmem [resolvable:$true] %s178_s10 }
  0x17   : > { %s168_s12 = scalar_lea.sflag [#allocation3], %s685_s29  ;;  %s466_s13 = scalar_lea.hbm %s694_s8, 128 }
  0x18   : > { %p467_p2 = scmp.ne.s32.totalorder %s694_s8, %s466_s13  ;;  %p468_p3 = pneg %p700_p13 }
  0x19   : > { %s471_s22 = scalar_lea.hbm %s849_s0, 256  ;;  %p472_p5 = scmp.lt.u32.totalorder %s694_s8, %s849_s0 }
  0x1a   : > { %p469_p4 = pnand %p468_p3, %p467_p2  ;;  %p473_p8 = scmp.lt.u32.totalorder %s471_s22, %s466_s13 }
  0x1b   : > { %p475_p9 = scmp.lt.u32.totalorder %s466_s13, %s694_s8 }
  0x1c   : > { %p470_p7 = pneg %p469_p4  ;;  %p474_p10 = por %p473_p8, %p472_p5 }
  0x1e   : > { %p476_p0 = por %p475_p9, %p474_p10 }
  0x20   : > { %p477_p1 = pnand %p476_p0, %p470_p7 }
  0x22   : > { %480 = shalt.err (!%p477_p1)
}
  0x23   : > { %s481_s6 = scalar_lea.vmem %s704_s10, 128  ;;  %s598_s7 = smov [#allocation2]  }
  0x24   : > { %p482_p2 = scmp.ne.s32.totalorder %s704_s10, %s481_s6  ;;  %s486_s9 = sshll.u32 %s598_s7, 4  ;;  %s487_s9 = int_to_ptr.vmem [resolvable:$false] %s486_s9 }
  0x25   : > { %s488_s14 = scalar_lea.vmem %s487_s9, 256  ;;  %p489_p11 = scmp.lt.s32.totalorder %s704_s10, %s487_s9 }
  0x26   : > { %p484_p4 = pnand %p482_p2, %p468_p3  ;;  %p490_p5 = scmp.lt.s32.totalorder %s488_s14, %s481_s6 }
  0x28   : > { %p485_p12 = pneg %p484_p4  ;;  %p491_p8 = por %p490_p5, %p489_p11 }
  0x2a   : > { %p492_p9 = pnand %p491_p8, %p485_p12 }
  0x2c   : > { %495 = shalt.err (!%p492_p9)
}
  0x2d   : > { %422 = dma.hbm_to_vmem [thread:$0]  (!%p700_p13), %s694_s8, 128, %s704_s10, %s168_s12  }
  0x2e   : > { %p861_p0 = scmp.lt.s32.totalorder %s596_s18, 3  ;;  %p862_p1 = scmp.ge.s32.totalorder %s596_s18, 1 }
  0x2f   : > { %s747_s23 = scalar_lea.hbm %s850_s1, %s400_s30  ;;  %s189_s25 = scalar_lea.vmem [#allocation5], %s399_s5 }
  0x30   : > { %p738_p7 = pnand %p862_p1, %p861_p0  ;;  %s196_s6 = sshll.u32 %s189_s25, 4  ;;  %s197_s6 = int_to_ptr.vmem [resolvable:$true] %s196_s6 }
  0x31   : > { %s186_s8 = scalar_lea.sflag [#allocation6], %s685_s29  ;;  %s496_s10 = scalar_lea.hbm %s747_s23, 128 }
  0x32   : > { %s863_s13 = scalar_select %p738_p7, 1, 0 }
  0x33   : > { %p497_p11 = scmp.ne.s32.totalorder %s747_s23, %s496_s10  ;;  %s501_s30 = scalar_lea.hbm %s850_s1, 256 }
  0x34   : > { %p502_p2 = scmp.lt.u32.totalorder %s747_s23, %s850_s1  ;;  %p503_p4 = scmp.lt.u32.totalorder %s501_s30, %s496_s10 }
  0x35   : > { %p499_p12 = pnand %p497_p11, %p468_p3  ;;  %p505_p8 = scmp.lt.u32.totalorder %s496_s10, %s747_s23 }
  0x36   : > { %p504_p5 = por %p503_p4, %p502_p2 }
  0x37   : > { %p500_p10 = pneg %p499_p12 }
  0x38   : > { %p506_p9 = por %p505_p8, %p504_p5 }
  0x3a   : > { %p507_p0 = pnand %p506_p9, %p500_p10 }
  0x3c   : > { %510 = shalt.err (!%p507_p0)
}
  0x3d   : > { %s511_s29 = scalar_lea.vmem %s197_s6, 128  ;;  %s599_s5 = smov [#allocation5]  }
  0x3e   : > { %p512_p1 = scmp.ne.s32.totalorder %s197_s6, %s511_s29  ;;  %s516_s20 = sshll.u32 %s599_s5, 4  ;;  %s517_s20 = int_to_ptr.vmem [resolvable:$false] %s516_s20 }
  0x3f   : > { %s518_s22 = scalar_lea.vmem %s517_s20, 256  ;;  %p519_p6 = scmp.lt.s32.totalorder %s197_s6, %s517_s20 }
  0x40   : > { %p514_p11 = pnand %p512_p1, %p468_p3  ;;  %p520_p7 = scmp.lt.s32.totalorder %s518_s22, %s511_s29 }
  0x42   : > { %p515_p12 = pneg %p514_p11  ;;  %p521_p2 = por %p520_p7, %p519_p6 }
  0x44   : > { %p522_p4 = pnand %p521_p2, %p515_p12 }
  0x46   : > { %525 = shalt.err (!%p522_p4)
}
  0x47   : > { %425 = dma.hbm_to_vmem [thread:$0]  (!%p700_p13), %s747_s23, 128, %s197_s6, %s186_s8  }
  0x48   : > { %p864_p10 = scmp.ne.s32.totalorder %s863_s13, 0 }
  0x49   : > { %s774_s25 = sand.u32 (!%p864_p10), 1, %s588_s16   ;;  %p865_p6 = scmp.ne.s32.totalorder (!%p864_p10), %s857_s26, 0 }
  0x4a   : > { %205 = sbr.rel (%p864_p10) target bundleno = 275 (0x113), region = 36  ;;  %s777_s10 = sshll.u32 (!%p864_p10), %s774_s25, 3 }
  0x4b   : > { %s208_s12 = scalar_lea.sflag (!%p864_p10), [#allocation3], %s774_s25  ;;  %s211_s7 = scalar_lea.vmem (!%p864_p10), [#allocation2], %s777_s10 }
  0x51   : > { %571 = dma.done.wait (%p865_p6), %s208_s12, 128  }
  0x52   : > { %573 = vsyncadd (%p865_p6), %s208_s12, 4294967168  ;;  %s217_s11 = scalar_lea.sflag [#allocation6], %s774_s25  ;;  %s220_s13 = scalar_lea.vmem [#allocation5], %s777_s10 }
  0x53   : > { %575 = dma.done.wait (%p865_p6), %s217_s11, 128  }
  0x54   : > { %577 = vsyncadd (%p865_p6), %s217_s11, 4294967168  ;;  %v250_v0 = vld [vmem:[%s211_s7] sm:$0xff]  ;;  %v251_v1 = vld [vmem:[%s220_s13] sm:$0xff]  ;;  %vm253_vm0 = vcmask 261120   ;;  %s410_s30 = sshll.u32 %s647_s19, 7  ;;  %s249_s9 = scalar_lea.vmem [#allocation7], %s777_s10 }
  0x55   : > { %v252_v2 = vadd.f32 %v251_v1, %v250_v0  ;;  %v407_v14 = vld [vmem:[%s851_s2] ss:$0 sm:$0xff]  ;;  %s303_s14 = sshll.u32 %s249_s9, 4  ;;  %s804_s20 = scalar_lea.hbm %s853_s4, %s410_s30  ;;  %s806_s14 = int_to_ptr.vmem [resolvable:$true] %s303_s14 }
  0x56   : > { %v408_v17 = vld [vmem:[%s852_s3] ss:$0 sm:$0xff]  ;;  %s290_s22 = scalar_lea.sflag [#allocation4], %s774_s25  ;;  %s526_s12 = scalar_lea.vmem %s806_s14, 128 }
  0x57   : > { %v254_v3 = vsel %vm253_vm0, %v252_v2, 0.0  ;;  %v259_v4 = vmul.f32 %v252_v2, %v252_v2  ;;  %p527_p13 = scmp.ne.s32.totalorder %s806_s14, %s526_s12  ;;  %p866_p3 = scmp.ne.s32.totalorder %s858_s27, 0 }
  0x58   : > { %255 = vadd.xlane.f32.xlu0 %v254_v3  ;;  %s600_s19 = smov [#allocation7]  }
  0x59   : > { %v260_v5 = vsel %vm253_vm0, %v259_v4, 0.0  ;;  %p528_p7 = pnand %p527_p13, %p866_p3  ;;  %s530_s10 = sshll.u32 %s600_s19, 4  ;;  %s531_s10 = int_to_ptr.vmem [resolvable:$false] %s530_s10 }
  0x5a   : > { %s532_s7 = scalar_lea.vmem %s531_s10, 256  ;;  %p533_p8 = scmp.lt.s32.totalorder %s806_s14, %s531_s10 }
  0x5b   : > { %p529_p5 = pneg %p528_p7  ;;  %p534_p9 = scmp.lt.s32.totalorder %s532_s7, %s526_s12 }
  0x5c   : > { %261 = vadd.xlane.f32.xlu0 %v260_v5 }
  0x5d   : > { %p535_p0 = por %p534_p9, %p533_p8 }
  0x5f   : > { %p536_p1 = pnand %p535_p0, %p529_p5 }
  0xe5   : > { %v256_v6 = vpop.xlane.xlu0 %255 }
  0xe6   : > { %v258_v7 = vmul.f32 0.03125, %v256_v6 }
  0xe8   : > { %v264_v9 = vmul.f32 %v258_v7, %v258_v7 }
  0xe9   : > { %v262_v8 = vpop.xlane.xlu0 %261 }
  0xea   : > { %v263_v10 = vmul.f32 0.03125, %v262_v8 }
  0xec   : > { %v265_v11 = vsub.f32 %v263_v10, %v264_v9 }
  0xee   : > { %v266_v12 = vmax.f32 %v265_v11, 0.0 }
  0xf0   : > { %v267_v13 = vadd.f32 1e-05, %v266_v12 }
  0xf2   : > { %464 = vrsqrt.f32 %v267_v13 }
  0xfc   : > { %v465_v15 = vpop.eup %464 }
  0xfd   : > { %v277_v16 = vmul.f32 %v465_v15, %v407_v14 }
  0xff   : > { %v278_v18 = vmul.f32 %v277_v16, %v258_v7  ;;  %v286_v20 = vmul.f32 %v277_v16, %v252_v2 }
 0x101   : > { %v285_v19 = vsub.f32 %v408_v17, %v278_v18 }
 0x103   : > { %v287_v21 = vadd.f32 %v286_v20, %v285_v19 }
 0x105   : > { %288 = vst.msk [vmem:[%s249_s9] sm:$0xff] %vm253_vm0, %v287_v21 }
 0x106   : > { %539 = shalt.err (!%p536_p1)
}
 0x107   : > { %s540_s25 = scalar_lea.hbm %s804_s20, 128  ;;  %s544_s26 = scalar_lea.hbm %s853_s4, 256 }
 0x108   : > { %p541_p11 = scmp.ne.s32.totalorder %s804_s20, %s540_s25  ;;  %p545_p4 = scmp.lt.u32.totalorder %s804_s20, %s853_s4 }
 0x109   : > { %p546_p10 = scmp.lt.u32.totalorder %s544_s26, %s540_s25  ;;  %p548_p13 = scmp.lt.u32.totalorder %s540_s25, %s804_s20 }
 0x10a   : > { %p542_p12 = pnand %p541_p11, %p866_p3 }
 0x10b   : > { %p547_p6 = por %p546_p10, %p545_p4 }
 0x10c   : > { %p543_p2 = pneg %p542_p12 }
 0x10d   : > { %p549_p7 = por %p548_p13, %p547_p6 }
 0x10f   : > { %p550_p5 = pnand %p549_p7, %p543_p2 }
 0x111   : > { %553 = shalt.err (!%p550_p5)
}
 0x112   : > { %417 = dma.vmem_to_hbm [thread:$0]  (%p866_p3), %s806_s14, 128, %s804_s20, %s290_s22  }
 0x113 PF: > { %s315_s8 = sand.u32 1, %s584_s15   ;;  %p867_p8 = scmp.ne.s32.totalorder %s859_s28, 0 }
 0x114   : > { %p868_p9 = scmp.ge.s32.totalorder %s596_s18, 2  ;;  %s316_s30 = scalar_lea.sflag [#allocation4], %s315_s8 }
 0x116   : > { %p427_p0 = pnand %p868_p9, %p867_p8 }
 0x118   : > { %579 = dma.done.wait (!%p427_p0), %s316_s30, 128  }
 0x119   : > { %581 = vsyncadd (!%p427_p0), %s316_s30, 4294967168  ;;  %p20_p1 = scmp.ge.s32.totalorder %s651_s21, 4   ;;  %s869_s15 = smov %s588_s16 }
 0x11a   : > { %s870_s16 = smov %s592_s17  ;;  %s871_s17 = smov %s663_s24 }
 0x11b   : > { %s872_s18 = smov %s651_s21  ;;  %22 = sbr.rel (!%p20_p1) target bundleno = 7 (0x7), region = 94 }
 0x122   :  { %321 = vsyncpa [#allocation3], 1 }
 0x123   :  { %323 = vsyncpa [#allocation3 + $0x1], 1 }
 0x124   :  { %324 = vsyncpa [#allocation6], 1 }
 0x125   :  { %326 = vsyncpa [#allocation6 + $0x1], 1 }
 0x126   :  { %327 = vsyncpa [#allocation4], 1 }
 0x127   :  { %329 = vsyncpa [#allocation4 + $0x1], 1 }

</bundles_post_ra>
